<compile_context>
chip_gen: v5e
topology: v5e:2x2
jax: 0.10.0
libtpu: 0.0.40
codegen_flags: <defaults>
</compile_context>

<pallas_src>
import numpy as np
import jax
import jax.numpy as jnp
from jax.experimental import pallas as pl
from jax.experimental.pallas import tpu as pltpu


# --------------------------------------------------------------------------- left-branch kernel
def _msg_left_kernel(s_ref, vpack_ref, W1_ref, b1_ref,
                     W2A_ref, b2A_ref, W2C_ref, b2C_ref,
                     leftAv_ref, leftC_ref):
    # per-source MLP; W2 columns were pre-packed to the kernel block order
    # [b | a | a | a] / [0 | c | c | c], and the source vectors are folded in here.
    h = jnp.dot(s_ref[...], W1_ref[...], preferred_element_type=jnp.float32) + b1_ref[...]
    h = h * jax.nn.sigmoid(h)                                               # SiLU
    leftA = jnp.dot(h, W2A_ref[...], preferred_element_type=jnp.float32) + b2A_ref[...]
    leftAv_ref[...] = leftA * vpack_ref[...]                                # [b | a*vx | a*vy | a*vz]
    leftC_ref[...] = jnp.dot(h, W2C_ref[...], preferred_element_type=jnp.float32) + b2C_ref[...]


# --------------------------------------------------------------------------- main kernel
def _deepdf_kernel(leftAv_ref, leftC_ref, pair_ref, st_ref, vt_ref,
                   WrA_ref, WrC_ref, Dsel_ref, WA3_ref, WB3_ref,
                   U1_ref, c1_ref, U2_ref, c2_ref, sel_ref,
                   out_ref, acc_ref):
    Tt, Ts, C = pair_ref.shape
    F = st_ref.shape[-1]
    F3, F4 = 3 * F, 4 * F
    s_idx = pl.program_id(1)

    @pl.when(s_idx == 0)
    def _():
        acc_ref[...] = jnp.zeros_like(acc_ref)

    # ---------------- message phase (every (t, s) step) ----------------------
    # three skinny (C x 4F) MXU matmuls on the streamed block:
    #   rA = mask*(exp@[Wb|Wa|Wa|Wa] + [bb|ba|ba|ba])   (mask/bias folded into the mask channel)
    #   rC = mask*(exp@[0 |Wc|Wc|Wc] + [0 |bc|bc|bc])
    #   dp = [0 | dx*1_F | dy*1_F | dz*1_F]             (direction lane-broadcast on the MXU)
    pm = pair_ref[...].reshape(Tt * Ts, C)                                  # free view (tile_s 8/16-aligned)
    rA = jnp.dot(pm, WrA_ref[...], preferred_element_type=jnp.float32).reshape(Tt, Ts, F4)
    rC = jnp.dot(pm, WrC_ref[...], preferred_element_type=jnp.float32).reshape(Tt, Ts, F4)
    dp = jnp.dot(pm, Dsel_ref[...], preferred_element_type=jnp.float32).reshape(Tt, Ts, F4)

    # fully lane-dense elementwise message: [delta_s | dv_x | dv_y | dv_z]
    msg = rA * leftAv_ref[...][None, :, :] + rC * (leftC_ref[...][None, :, :] * dp)
    acc_ref[...] += jnp.sum(msg, axis=1)                                    # reduce over source tile

    # ---------------- extended update (only on the last source step) ---------
    @pl.when(s_idx == pl.num_programs(1) - 1)
    def _():
        scalar_state = st_ref[...]                                          # (Tt, F)
        vsp = vt_ref[...]                                                   # (Tt, 3F) [vx|vy|vz]
        acc = acc_ref[...]
        scalar_upd = acc[:, 0:F]
        vup = acc[:, F:F4]                                                  # (Tt, 3F)

        # single block-diagonal matmuls instead of 6 tiny per-component dots
        vs2p = jnp.dot(vsp, WA3_ref[...], preferred_element_type=jnp.float32)
        vu2p = jnp.dot(vup, WB3_ref[...], preferred_element_type=jnp.float32)

        comps = lambda x: [x[:, d * F:(d + 1) * F] for d in range(3)]
        vs, vu, vs2, vu2 = comps(vsp), comps(vup), comps(vs2p), comps(vu2p)

        vdot = lambda x, y: x[0] * y[0] + x[1] * y[1] + x[2] * y[2]
        vcross = lambda x, y: [x[1] * y[2] - x[2] * y[1],
                               x[2] * y[0] - x[0] * y[2],
                               x[0] * y[1] - x[1] * y[0]]

        norm0 = jnp.sqrt(vdot(vs, vs))
        norm1 = jnp.sqrt(vdot(vu, vu))
        norm2 = jnp.sqrt(vdot(vs2, vs2))
        norm3 = jnp.sqrt(vdot(vu2, vu2))
        c0 = vcross(vs, vu)
        c2 = vcross(vs2, vu)
        c0n = vdot(c0, c0)
        c2n = vdot(c2, c2)
        mul0 = vdot(vs, vu)
        mul1 = vdot(vs, vu2)
        mul2 = vdot(vs2, vu)
        mul3 = vdot(vs2, vu2)

        # kernel-local feature order (U1 rows pre-permuted to match):
        #   [scalar_state | scalar_upd | norm0..3 | cross0_n | cross2_n | mul0..3]
        feats = jnp.concatenate([scalar_state, scalar_upd, norm0, norm1, norm2, norm3,
                                 c0n, c2n, mul0, mul1, mul2, mul3], axis=-1)          # (Tt, 12F)

        g = jnp.dot(feats, U1_ref[...], preferred_element_type=jnp.float32) + c1_ref[...]
        g = g * jax.nn.sigmoid(g)
        gates = jnp.dot(g, U2_ref[...], preferred_element_type=jnp.float32) + c2_ref[...]  # (Tt, 14F)

        g_vs2 = gates[:, 0:F]
        g_vu = gates[:, F:2 * F]
        g_vu2 = gates[:, 2 * F:3 * F]
        # 11 gated scalar terms: one elementwise product + one small selector matmul
        scalar_gated = jnp.dot(gates[:, 3 * F:] * feats[:, F:], sel_ref[...],
                               preferred_element_type=jnp.float32)                    # (Tt, F)

        # lane-dense packed output [scalar | v_x | v_y | v_z] written at static offsets
        out_ref[:, 0:F] = scalar_state + scalar_gated
        for d in range(3):
            out_ref[:, (d + 1) * F:(d + 2) * F] = (vs[d] + g_vs2 * vs2[d]
                                                   + g_vu * vu[d] + g_vu2 * vu2[d])


# --------------------------------------------------------------------------- helpers
def _vmem_limit_bytes():
    try:
        cap = int(pltpu.get_tpu_info().vmem_capacity_bytes)
    except Exception:
        cap = 64 * 1024 * 1024                 # conservative (v7x-sized) fallback
    return max(min((cap * 3) // 4, 100 * 1024 * 1024), 32 * 1024 * 1024)


def _pick_tile(n, cap, mult):
    cap = max(1, min(cap, n))
    for t in range(cap, 0, -1):
        if n % t == 0 and (t % mult == 0 or t == n):
            return t
    return n


# --------------------------------------------------------------------------- wrapper
def deepdf_forward(scalar, vector, expansion, direction, mask, params,
                   tile_t=None, tile_s=None, stream_dtype=jnp.float32):
    """scalar (N,1,F), vector (N,3,F), expansion (N,N,E), direction (N,N,3), mask (N,N,1)."""
    N, one, F = scalar.shape
    assert one == 1
    E = expansion.shape[-1]
    C = E + 4
    F3, F4 = 3 * F, 4 * F
    f32 = jnp.float32
    itemsize = jnp.dtype(stream_dtype).itemsize
    sub = 16 if itemsize < 4 else 8
    vmem_limit = _vmem_limit_bytes()

    # per-generation tile choice: the streamed pair block is lane-padded to >=128
    # lanes in VMEM and double-buffered; keep it under ~1/3 of the VMEM budget.
    if tile_t is None or tile_s is None:
        lane_pad = max(128, C)
        cap = 256
        while cap > 16 and 2 * cap * cap * lane_pad * itemsize > vmem_limit // 3:
            cap //= 2
        if tile_t is None:
            tile_t = _pick_tile(N, cap, 8)
        if tile_s is None:
            tile_s = _pick_tile(N, cap, sub)
    assert N % tile_t == 0 and N % tile_s == 0
    assert tile_t == N or tile_t % 8 == 0
    # keeps the in-kernel (Tt,Ts,C)->(Tt*Ts,C) reshape a free view
    assert tile_s == N or tile_s % sub == 0

    # ---- input preprocessing (wrapper-side layout plumbing, O(N) / O(N^2) once) ----
    s2d = scalar.reshape(N, F).astype(f32)
    v_flat = vector.reshape(N, F3).astype(f32)                              # [vx | vy | vz]
    vpack = jnp.concatenate([jnp.ones((N, F), f32), v_flat], axis=-1)       # (N, 4F) = [1|vx|vy|vz]

    # fused O(N^2) stream: [mask*expansion | direction | mask]; the mask channel
    # carries the (masked) right-branch bias via the last row of WrA / WrC.
    mexp = expansion.astype(f32) * mask.astype(f32)
    pair = jnp.concatenate([mexp, direction.astype(f32), mask.astype(f32)],
                           axis=-1).astype(stream_dtype)                    # (N, N, E+4)

    # ---- parameter preprocessing (once, outside the grid) ----
    W1, b1 = params["W1"].astype(f32), params["b1"].astype(f32)
    W2, b2 = params["W2"].astype(f32), params["b2"].astype(f32)
    Wr, br = params["Wr"].astype(f32), params["br"].astype(f32)
    WA, WB = params["WA"].astype(f32), params["WB"].astype(f32)

    Wa, Wb, Wc = Wr[:, 0:F], Wr[:, F:2 * F], Wr[:, 2 * F:]
    ba, bb, bc = br[:, 0:F], br[:, F:2 * F], br[:, 2 * F:]
    zerosE = jnp.zeros((E, F), f32)
    zeros1 = jnp.zeros((1, F), f32)
    zdir = jnp.zeros((3, F4), f32)
    WrA = jnp.concatenate([
        jnp.concatenate([Wb, Wa, Wa, Wa], axis=1),          # expansion rows
        zdir,                                               # direction rows (zero)
        jnp.concatenate([bb, ba, ba, ba], axis=1),          # mask row -> masked bias
    ], axis=0).astype(stream_dtype)                         # (C, 4F)
    WrC = jnp.concatenate([
        jnp.concatenate([zerosE, Wc, Wc, Wc], axis=1),
        zdir,
        jnp.concatenate([zeros1, bc, bc, bc], axis=1),
    ], axis=0).astype(stream_dtype)                         # (C, 4F)
    # direction lane-broadcast done on the MXU: pair @ Dsel = [0 | dx*1F | dy*1F | dz*1F]
    Dsel_np = np.zeros((C, F4), np.float32)
    for d in range(3):
        Dsel_np[E + d, (d + 1) * F:(d + 2) * F] = 1.0
    Dsel = jnp.asarray(Dsel_np).astype(stream_dtype)

    W2a, W2b, W2c = W2[:, 0:F], W2[:, F:2 * F], W2[:, 2 * F:]
    b2a, b2b, b2c = b2[:, 0:F], b2[:, F:2 * F], b2[:, 2 * F:]
    W2A = jnp.concatenate([W2b, W2a, W2a, W2a], axis=1)                     # (F, 4F)
    b2A = jnp.concatenate([b2b, b2a, b2a, b2a], axis=1)                     # (1, 4F)
    W2C = jnp.concatenate([jnp.zeros((F, F), f32), W2c, W2c, W2c], axis=1)
    b2C = jnp.concatenate([zeros1, b2c, b2c, b2c], axis=1)

    WA3 = jnp.kron(jnp.eye(3, dtype=f32), WA)                               # (3F, 3F) block-diag
    WB3 = jnp.kron(jnp.eye(3, dtype=f32), WB)

    U1 = params["U1"].astype(f32)
    U1p = jnp.concatenate([U1[10 * F:12 * F], U1[0:10 * F]], axis=0)        # (12F, 8F), kernel feat order
    c1 = params["c1"].astype(f32)
    keep = [0, 1, 2, 3, 4, 5, 6, 7, 8, 10, 12, 13, 14, 15]                  # drop unused gates 9, 11
    cols = np.concatenate([np.arange(k * F, (k + 1) * F) for k in keep])
    U2p = params["U2"].astype(f32)[:, cols]                                 # (8F, 14F)
    c2p = params["c2"].astype(f32)[:, cols]                                 # (1, 14F)
    sel11 = jnp.tile(jnp.eye(F, dtype=f32), (11, 1))                        # (11F, F) group-sum selector

    # ---- stage 1: per-source "left" MLP (hoisted out of the O(N^2) grid) ----
    row = lambda w: pl.BlockSpec((tile_t, w), lambda i: (i, 0))
    cst2 = lambda shp: pl.BlockSpec(shp, lambda i: (0, 0))
    leftAv, leftC = pl.pallas_call(
        _msg_left_kernel,
        grid=(N // tile_t,),
        in_specs=[row(F), row(F4),
                  cst2((F, F)), cst2((1, F)),
                  cst2((F, F4)), cst2((1, F4)),
                  cst2((F, F4)), cst2((1, F4))],
        out_specs=(row(F4), row(F4)),
        out_shape=(jax.ShapeDtypeStruct((N, F4), f32),
                   jax.ShapeDtypeStruct((N, F4), f32)),
        compiler_params=pltpu.CompilerParams(dimension_semantics=("parallel",)),
    )(s2d, vpack, W1, b1, W2A, b2A, W2C, b2C)

    # ---- stage 2: fused message + extended update, 2-D (target x source) grid ----
    grid = (N // tile_t, N // tile_s)
    tmap = lambda shp: pl.BlockSpec(shp, lambda t, s: (t, 0))
    smap = lambda shp: pl.BlockSpec(shp, lambda t, s: (s, 0))
    cst = lambda shp: pl.BlockSpec(shp, lambda t, s: tuple(0 for _ in shp))
    # TODO(synk): single-buffer the constant-index inputs (pipeline_mode=pl.Buffered(1))
    # to reclaim their double-buffer VMEM once that path is validated on all generations.

    in_specs = [
        smap((tile_s, F4)),                                         # leftAv (source block)
        smap((tile_s, F4)),                                         # leftC
        pl.BlockSpec((tile_t, tile_s, C), lambda t, s: (t, s, 0)),  # pair stream
        tmap((tile_t, F)),                                          # scalar target tile
        tmap((tile_t, F3)),                                         # vector target tile
        cst((C, F4)), cst((C, F4)), cst((C, F4)),                   # WrA, WrC, Dsel
        cst((F3, F3)), cst((F3, F3)),                               # WA3, WB3
        cst((12 * F, 8 * F)), cst((1, 8 * F)),                      # U1p, c1
        cst((8 * F, 14 * F)), cst((1, 14 * F)),                     # U2p, c2p
        cst((11 * F, F)),                                           # sel11
    ]
    out_spec = pl.BlockSpec((tile_t, F4), lambda t, s: (t, 0))

    flops = 2 * N * N * C * (3 * F4)                      # three pair matmuls
    flops += 6 * N * N * F4                               # elementwise message + source reduce
    flops += 2 * N * (F * F + 2 * F * F4)                 # left MLP
    flops += 2 * N * (2 * F3 * F3 + 12 * F * 8 * F + 8 * F * 14 * F + 11 * F * F)
    bytes_accessed = (N * N * C * itemsize
                      + 4 * (N * (F + F3 + 3 * F4) + N * F4)
                      + 4 * (3 * C * F4 + 2 * F3 * F3 + 12 * F * 8 * F
                             + 8 * F * 14 * F + 11 * F * F))
    ce = pl.CostEstimate(flops=int(flops), transcendentals=int(13 * N * F),
                         bytes_accessed=int(bytes_accessed))

    packed = pl.pallas_call(
        _deepdf_kernel,
        grid=grid,
        in_specs=in_specs,
        out_specs=out_spec,
        out_shape=jax.ShapeDtypeStruct((N, F4), f32),
        scratch_shapes=[pltpu.VMEM((tile_t, F4), f32)],
        compiler_params=pltpu.CompilerParams(
            dimension_semantics=("parallel", "arbitrary"),
            vmem_limit_bytes=int(vmem_limit)),
        cost_estimate=ce,
    )(leftAv, leftC, pair, s2d, v_flat,
      WrA, WrC, Dsel, WA3, WB3, U1p, c1, U2p, c2p, sel11)

    new_scalar = packed[:, 0:F].reshape(N, 1, F)
    new_vector = packed[:, F:].reshape(N, 3, F)
    return new_scalar, new_vector


# --------------------------------------------------------------------------- reference (pure JAX, torch semantics)
def reference_forward(scalar, vector, expansion, direction, mask, p):
    silu = jax.nn.silu
    left = silu(scalar @ p["W1"] + p["b1"][0]) @ p["W2"] + p["b2"][0]          # (N,1,3F)
    right = (expansion @ p["Wr"] + p["br"][0])[..., None, :]                   # (N,N,1,3F)
    prod = left * right
    a, b, c = jnp.split(prod, 3, axis=-1)
    mask_ = mask[..., None]
    delta_s = jnp.sum(mask_ * b, axis=-3)
    dv_right = direction[..., None] * c
    dv_left = vector * a
    delta_v = jnp.sum(mask_ * (dv_left + dv_right), axis=-3)
    # update
    scalar_state, vector_state = scalar, vector
    scalar_upd, vector_upd = delta_s, delta_v
    vs2 = vector_state @ p["WA"]
    vu2 = vector_upd @ p["WB"]
    nrm = lambda x: jnp.linalg.norm(x, axis=-2, keepdims=True)
    norm0, norm1, norm2, norm3 = nrm(vector_state), nrm(vector_upd), nrm(vs2), nrm(vu2)
    cross0 = jnp.cross(vector_state, vector_upd, axis=-2)
    cross2 = jnp.cross(vs2, vector_upd, axis=-2)
    cross0_n = nrm(cross0) ** 2
    cross2_n = nrm(cross2) ** 2
    mul0 = jnp.sum(vector_state * vector_upd, axis=-2, keepdims=True)
    mul1 = jnp.sum(vector_state * vu2, axis=-2, keepdims=True)
    mul2 = jnp.sum(vs2 * vector_upd, axis=-2, keepdims=True)
    mul3 = jnp.sum(vs2 * vu2, axis=-2, keepdims=True)
    feats = jnp.concatenate([norm0, norm1, norm2, norm3, cross0_n, cross2_n,
                             mul0, mul1, mul2, mul3, scalar_state, scalar_upd], axis=-1)
    gates = silu(feats @ p["U1"] + p["c1"][0]) @ p["U2"] + p["c2"][0]
    gs = jnp.split(gates, 16, axis=-1)
    new_vector = vector_state + gs[0] * vs2 + gs[1] * vector_upd + gs[2] * vu2
    new_scalar = (scalar_state + gs[3] * scalar_upd
                  + gs[4] * norm0 + gs[5] * norm1 + gs[6] * norm2 + gs[7] * norm3
                  + gs[8] * cross0_n + gs[10] * cross2_n
                  + gs[12] * mul0 + gs[13] * mul1 + gs[14] * mul2 + gs[15] * mul3)
    return new_scalar, new_vector


# --------------------------------------------------------------------------- params
def init_params(key, F=32, E=20):
    ks = jax.random.split(key, 8)

    def lin(k, fin, fout):
        kw, kb = jax.random.split(k)
        lim = 1.0 / np.sqrt(fin)
        W = jax.random.uniform(kw, (fin, fout), jnp.float32, -lim, lim)
        b = jax.random.uniform(kb, (1, fout), jnp.float32, -lim, lim)
        return W, b

    W1, b1 = lin(ks[0], F, F)
    W2, b2 = lin(ks[1], F, 3 * F)
    Wr, br = lin(ks[2], E, 3 * F)
    WA, _ = lin(ks[3], F, F)        # Linear(..., bias=False)
    WB, _ = lin(ks[4], F, F)
    U1, c1 = lin(ks[5], 12 * F, 8 * F)
    U2, c2 = lin(ks[6], 8 * F, 16 * F)
    return dict(W1=W1, b1=b1, W2=W2, b2=b2, Wr=Wr, br=br,
                WA=WA, WB=WB, U1=U1, c1=c1, U2=U2, c2=c2)


# --------------------------------------------------------------------------- main
if __name__ == "__main__":
    N, F, E = 64, 32, 20          # nodes, num_features, size_of_expansion
    key = jax.random.PRNGKey(0)
    kp, k1, k2, k3, k4, k5 = jax.random.split(key, 6)

    params = init_params(kp, F=F, E=E)
    scalar = jax.random.normal(k1, (N, 1, F), jnp.float32)
    vector = jax.random.normal(k2, (N, 3, F), jnp.float32)
    expansion = jax.random.normal(k3, (N, N, E), jnp.float32)
    direction = jax.random.normal(k4, (N, N, 3), jnp.float32)
    mask = (jax.random.uniform(k5, (N, N, 1)) > 0.5).astype(jnp.float32)

    ref_s, ref_v = reference_forward(scalar, vector, expansion, direction, mask, params)

    # ---- exact f32 stream, explicit 2x2 (target x source) grid: exercises the VMEM
    # accumulator + pl.when init/finalize path.
    out_s, out_v = deepdf_forward(scalar, vector, expansion, direction, mask, params,
                                  tile_t=32, tile_s=32, stream_dtype=jnp.float32)
    out_s, out_v = jax.block_until_ready(out_s), jax.block_until_ready(out_v)
    np.testing.assert_allclose(np.asarray(out_s), np.asarray(ref_s), rtol=2e-3, atol=2e-3)
    np.testing.assert_allclose(np.asarray(out_v), np.asarray(ref_v), rtol=2e-3, atol=2e-3)

    # ---- bf16 O(N^2) stream (halves the pairwise HBM traffic), auto tiles picked from
    # the per-generation VMEM budget.  Compared against the reference evaluated with the
    # identically bf16-quantized pairwise inputs, isolating kernel correctness from the
    # intentional bf16 quantization of the N^2 stream.
    out_s16, out_v16 = deepdf_forward(scalar, vector, expansion, direction, mask, params,
                                      stream_dtype=jnp.bfloat16)
    out_s16, out_v16 = jax.block_until_ready(out_s16), jax.block_until_ready(out_v16)
    q = lambda x: x.astype(jnp.bfloat16).astype(jnp.float32)
    params_q = dict(params)
    params_q["Wr"], params_q["br"] = q(params["Wr"]), q(params["br"])
    ref_s16, ref_v16 = reference_forward(scalar, vector, q(expansion), q(direction), mask, params_q)
    np.testing.assert_allclose(np.asarray(out_s16), np.asarray(ref_s16), rtol=2e-3, atol=2e-3)
    np.testing.assert_allclose(np.asarray(out_v16), np.asarray(ref_v16), rtol=2e-3, atol=2e-3)

    print("KERNEL_OK")
</pallas_src>

<mosaic_0001>
module attributes {stable_mosaic.version = 11 : i64} {
  func.func @_msg_left_kernel(%arg0: i32, %arg1: memref<32x32xf32, #tpu.memory_space<vmem>>, %arg2: memref<32x128xf32, #tpu.memory_space<vmem>>, %arg3: memref<32x32xf32, #tpu.memory_space<vmem>>, %arg4: memref<1x32xf32, #tpu.memory_space<vmem>>, %arg5: memref<32x128xf32, #tpu.memory_space<vmem>>, %arg6: memref<1x128xf32, #tpu.memory_space<vmem>>, %arg7: memref<32x128xf32, #tpu.memory_space<vmem>>, %arg8: memref<1x128xf32, #tpu.memory_space<vmem>>, %arg9: memref<32x128xf32, #tpu.memory_space<vmem>>, %arg10: memref<32x128xf32, #tpu.memory_space<vmem>>) attributes {dimension_semantics = [#tpu.dimension_semantics<parallel>], iteration_bounds = array<i64: 2>, scalar_prefetch = 0 : i64, scratch_operands = 0 : i64, tpu.core_type = #tpu.core_type<tc>, window_params = [{transform_indices = @transform_0, window_bounds = array<i64: 32, 32>}, {transform_indices = @transform_1, window_bounds = array<i64: 32, 128>}, {pipeline_mode = #tpu.pipeline_mode<synchronous>, transform_indices = @transform_2, window_bounds = array<i64: 32, 32>}, {pipeline_mode = #tpu.pipeline_mode<synchronous>, transform_indices = @transform_3, window_bounds = array<i64: 1, 32>}, {pipeline_mode = #tpu.pipeline_mode<synchronous>, transform_indices = @transform_4, window_bounds = array<i64: 32, 128>}, {pipeline_mode = #tpu.pipeline_mode<synchronous>, transform_indices = @transform_5, window_bounds = array<i64: 1, 128>}, {pipeline_mode = #tpu.pipeline_mode<synchronous>, transform_indices = @transform_6, window_bounds = array<i64: 32, 128>}, {pipeline_mode = #tpu.pipeline_mode<synchronous>, transform_indices = @transform_7, window_bounds = array<i64: 1, 128>}, {transform_indices = @transform_8, window_bounds = array<i64: 32, 128>}, {transform_indices = @transform_9, window_bounds = array<i64: 32, 128>}]} {
    %c0 = arith.constant 0 : index
    %c0_0 = arith.constant 0 : index
    %0 = vector.load %arg1[%c0, %c0_0] : memref<32x32xf32, #tpu.memory_space<vmem>>, vector<32x32xf32>
    %c0_1 = arith.constant 0 : index
    %c0_2 = arith.constant 0 : index
    %1 = vector.load %arg3[%c0_1, %c0_2] : memref<32x32xf32, #tpu.memory_space<vmem>>, vector<32x32xf32>
    %cst = arith.constant dense<0.000000e+00> : vector<32x32xf32>
    %2 = tpu.matmul %0, %1, %cst {dimension_numbers = #tpu.dot_dimension_numbers<[1], [0], [0], [1], [0, 0, 1, 1], [], []>} : vector<32x32xf32>, vector<32x32xf32>, vector<32x32xf32> -> vector<32x32xf32>
    %c0_3 = arith.constant 0 : index
    %c0_4 = arith.constant 0 : index
    %3 = vector.load %arg4[%c0_3, %c0_4] : memref<1x32xf32, #tpu.memory_space<vmem>>, vector<1x32xf32>
    %4 = vector.broadcast %3 : vector<1x32xf32> to vector<32x32xf32>
    %5 = arith.addf %2, %4 : vector<32x32xf32>
    %6 = arith.negf %5 : vector<32x32xf32>
    %7 = math.exp %6 : vector<32x32xf32>
    %cst_5 = arith.constant 1.000000e+00 : f32
    %8 = vector.broadcast %cst_5 : f32 to vector<32x32xf32>
    %9 = arith.addf %8, %7 : vector<32x32xf32>
    %10 = arith.divf %8, %9 : vector<32x32xf32>
    %11 = arith.mulf %5, %10 : vector<32x32xf32>
    %c0_6 = arith.constant 0 : index
    %c0_7 = arith.constant 0 : index
    %12 = vector.load %arg5[%c0_6, %c0_7] : memref<32x128xf32, #tpu.memory_space<vmem>>, vector<32x128xf32>
    %cst_8 = arith.constant dense<0.000000e+00> : vector<32x128xf32>
    %13 = tpu.matmul %11, %12, %cst_8 {dimension_numbers = #tpu.dot_dimension_numbers<[1], [0], [0], [1], [0, 0, 1, 1], [], []>} : vector<32x32xf32>, vector<32x128xf32>, vector<32x128xf32> -> vector<32x128xf32>
    %c0_9 = arith.constant 0 : index
    %c0_10 = arith.constant 0 : index
    %14 = vector.load %arg6[%c0_9, %c0_10] : memref<1x128xf32, #tpu.memory_space<vmem>>, vector<1x128xf32>
    %15 = vector.broadcast %14 : vector<1x128xf32> to vector<32x128xf32>
    %16 = arith.addf %13, %15 : vector<32x128xf32>
    %c0_11 = arith.constant 0 : index
    %c0_12 = arith.constant 0 : index
    %17 = vector.load %arg2[%c0_11, %c0_12] : memref<32x128xf32, #tpu.memory_space<vmem>>, vector<32x128xf32>
    %18 = arith.mulf %16, %17 : vector<32x128xf32>
    %c0_13 = arith.constant 0 : index
    %c0_14 = arith.constant 0 : index
    %19 = vector.load %arg9[%c0_13, %c0_14] : memref<32x128xf32, #tpu.memory_space<vmem>>, vector<32x128xf32>
    tpu.vector_store %arg9[%c0_13, %c0_14], %18 {strides = array<i32>} : memref<32x128xf32, #tpu.memory_space<vmem>>, vector<32x128xf32>,
    %c0_15 = arith.constant 0 : index
    %c0_16 = arith.constant 0 : index
    %20 = vector.load %arg7[%c0_15, %c0_16] : memref<32x128xf32, #tpu.memory_space<vmem>>, vector<32x128xf32>
    %cst_17 = arith.constant dense<0.000000e+00> : vector<32x128xf32>
    %21 = tpu.matmul %11, %20, %cst_17 {dimension_numbers = #tpu.dot_dimension_numbers<[1], [0], [0], [1], [0, 0, 1, 1], [], []>} : vector<32x32xf32>, vector<32x128xf32>, vector<32x128xf32> -> vector<32x128xf32>
    %c0_18 = arith.constant 0 : index
    %c0_19 = arith.constant 0 : index
    %22 = vector.load %arg8[%c0_18, %c0_19] : memref<1x128xf32, #tpu.memory_space<vmem>>, vector<1x128xf32>
    %23 = vector.broadcast %22 : vector<1x128xf32> to vector<32x128xf32>
    %24 = arith.addf %21, %23 : vector<32x128xf32>
    %c0_20 = arith.constant 0 : index
    %c0_21 = arith.constant 0 : index
    %25 = vector.load %arg10[%c0_20, %c0_21] : memref<32x128xf32, #tpu.memory_space<vmem>>, vector<32x128xf32>
    tpu.vector_store %arg10[%c0_20, %c0_21], %24 {strides = array<i32>} : memref<32x128xf32, #tpu.memory_space<vmem>>, vector<32x128xf32>,
    return
  }
  func.func @transform_0(%arg0: i32) -> (i32, i32) {
    %c0_i32 = arith.constant 0 : i32
    %c0_i32_0 = arith.constant 0 : i32
    return %arg0, %c0_i32 : i32, i32
  }
  func.func @transform_1(%arg0: i32) -> (i32, i32) {
    %c0_i32 = arith.constant 0 : i32
    %c0_i32_0 = arith.constant 0 : i32
    return %arg0, %c0_i32 : i32, i32
  }
  func.func @transform_2(%arg0: i32) -> (i32, i32) {
    %c0_i32 = arith.constant 0 : i32
    %c0_i32_0 = arith.constant 0 : i32
    %c0_i32_1 = arith.constant 0 : i32
    return %c0_i32, %c0_i32_0 : i32, i32
  }
  func.func @transform_3(%arg0: i32) -> (i32, i32) {
    %c0_i32 = arith.constant 0 : i32
    %c0_i32_0 = arith.constant 0 : i32
    %c0_i32_1 = arith.constant 0 : i32
    return %c0_i32, %c0_i32_0 : i32, i32
  }
  func.func @transform_4(%arg0: i32) -> (i32, i32) {
    %c0_i32 = arith.constant 0 : i32
    %c0_i32_0 = arith.constant 0 : i32
    %c0_i32_1 = arith.constant 0 : i32
    return %c0_i32, %c0_i32_0 : i32, i32
  }
  func.func @transform_5(%arg0: i32) -> (i32, i32) {
    %c0_i32 = arith.constant 0 : i32
    %c0_i32_0 = arith.constant 0 : i32
    %c0_i32_1 = arith.constant 0 : i32
    return %c0_i32, %c0_i32_0 : i32, i32
  }
  func.func @transform_6(%arg0: i32) -> (i32, i32) {
    %c0_i32 = arith.constant 0 : i32
    %c0_i32_0 = arith.constant 0 : i32
    %c0_i32_1 = arith.constant 0 : i32
    return %c0_i32, %c0_i32_0 : i32, i32
  }
  func.func @transform_7(%arg0: i32) -> (i32, i32) {
    %c0_i32 = arith.constant 0 : i32
    %c0_i32_0 = arith.constant 0 : i32
    %c0_i32_1 = arith.constant 0 : i32
    return %c0_i32, %c0_i32_0 : i32, i32
  }
  func.func @transform_8(%arg0: i32) -> (i32, i32) {
    %c0_i32 = arith.constant 0 : i32
    %c0_i32_0 = arith.constant 0 : i32
    return %arg0, %c0_i32 : i32, i32
  }
  func.func @transform_9(%arg0: i32) -> (i32, i32) {
    %c0_i32 = arith.constant 0 : i32
    %c0_i32_0 = arith.constant 0 : i32
    return %arg0, %c0_i32 : i32, i32
  }
}

</mosaic_0001>

<bundles_post_ra>
// kernel: tpu_custom_call.1
= control target key start
LH: loop header
LB: loop body
LE: loop exit
PB: predicated region body
PF: predicated region fallthrough
CT: control target
= control target key end

     0   :  { %s1363_s0 = inlined_call_operand.vmem [shape: f32[64,32], index: 0, kind: input, shape index: {}]   ;;  %s1364_s1 = inlined_call_operand.vmem [shape: f32[64,128], index: 1, kind: input, shape index: {}]   ;;  %s1365_s2 = inlined_call_operand.vmem [shape: f32[32,32], index: 2, kind: input, shape index: {}]   ;;  %s1366_s3 = inlined_call_operand.vmem [shape: f32[1,32], index: 3, kind: input, shape index: {}]   ;;  %s1367_s4 = inlined_call_operand.hbm [shape: f32[32,128], index: 4, kind: input, shape index: {}]   ;;  %s1368_s5 = inlined_call_operand.vmem [shape: f32[1,128], index: 5, kind: input, shape index: {}]   ;;  %s1369_s6 = inlined_call_operand.hbm [shape: f32[32,128], index: 6, kind: input, shape index: {}]   ;;  %s1370_s7 = inlined_call_operand.vmem [shape: f32[1,128], index: 7, kind: input, shape index: {}]   ;;  %s1371_s8 = inlined_call_operand.hbm [shape: f32[64,128], index: 8, kind: output, shape index: {0}]   ;;  %s1372_s9 = inlined_call_operand.hbm [shape: f32[64,128], index: 9, kind: output, shape index: {1}]  }
   0x1   :  { %1373 = sst [smem:[#allocation14_spill]] %s1363_s0 }
   0x2   :  { %1374 = sst [smem:[#allocation15_spill]] %s1364_s1 }
   0x3   :  { %1375 = sst [smem:[#allocation16_spill]] %s1365_s2 }
   0x4   :  { %1376 = sst [smem:[#allocation17_spill]] %s1366_s3 }
   0x5   :  { %15 = vsyncpa [#allocation3], 0 }
   0x6   :  { %16 = vsyncpa [#allocation6], 0 }
   0x7   :  { %17 = vsyncpa [#allocation4], 0 }
   0x8   :  { %19 = vsyncpa [#allocation4 + $0x1], 0 }
   0x9   :  { %20 = vsyncpa [#allocation9], 0 }
   0xa   :  { %22 = vsyncpa [#allocation9 + $0x1], 0  ;;  %s1165_s30 = smov 0   ;;  %s1167_s10 = smov 0  }
   0xb   :  { %s1169_s11 = smov 0   ;;  %s1171_s12 = smov 0  }
   0xc LB: > { %s1186_s13 = sadd.s32 4294967295, %s1107_s12   ;;  %s805_s14 = sadd.s32 4294967294, %s1107_s12   ;;  %s1107_s12 = sphi %s1171_s12, %s1387_s12   ;;  %s1103_s11 = sphi %s1169_s11, %s1386_s11   ;;  %s1099_s10 = sphi %s1167_s10, %s1385_s10   ;;  %s1095_s30 = sphi %s1165_s30, %s1384_s30  }
   0xd   : > { %s1190_s15 = sadd.s32 1, %s1107_s12   ;;  %s213_s16 = sadd.s32 1, %s1103_s11 }
   0xe   : > { %s210_s17 = ssub.s32 %s1107_s12, %s1190_s15  ;;  %p223_p0 = scmp.ne.s32.totalorder %s1103_s11, %s1099_s10 }
   0xf   : > { %p211_p1 = scmp.eq.s32.totalorder %s210_s17, 0  ;;  %p224_p2 = scmp.eq.s32.totalorder %s1186_s13, 1 }
  0x10   : > { %p229_p3 = scmp.ne.s32.totalorder %s1099_s10, %s1095_s30  ;;  %p230_p4 = scmp.eq.s32.totalorder %s805_s14, 1 }
  0x11   : > { %s1201_s18 = scalar_select %p211_p1, %s1103_s11, %s213_s16  }
  0x12   : > { %p1203_p5 = por %p224_p2, %p223_p0  ;;  %p1207_p6 = por %p230_p4, %p229_p3 }
  0x13   : > { %p806_p7 = scmp.ge.s32.totalorder %s1107_s12, 1  ;;  %p263_p8 = scmp.lt.s32.totalorder %s1107_s12, 3 }
  0x14   : > { %p883_p9 = scmp.eq.s32.totalorder %s1186_s13, 0  ;;  %s280_s24 = sshll.u32 %s1367_s4, 4  ;;  %s281_s24 = int_to_ptr.hbm [resolvable:$true] %s280_s24 }
  0x15   : > { %p1214_p10 = pnand %p806_p7, %p263_p8  ;;  %s1109_s25 = smov [#allocation2]  }
  0x16   : > { %s282_s26 = sshll.u32 %s1109_s25, 4  ;;  %s297_s29 = sshll.u32 %s1369_s6, 4  ;;  %s283_s26 = int_to_ptr.vmem [resolvable:$true] %s282_s26  ;;  %s298_s29 = int_to_ptr.hbm [resolvable:$true] %s297_s29 }
  0x17   : > { %p869_p11 = pneg %p1214_p10  ;;  %s1110_s14 = smov 128  }
  0x18   : > { %s1111_s16 = smov 8   ;;  %s1112_s17 = smov [#allocation5]  }
  0x19   : > { %p870_p12 = pnand %p883_p9, %p869_p11  ;;  %s299_s22 = sshll.u32 %s1112_s17, 4  ;;  %s300_s22 = int_to_ptr.vmem [resolvable:$true] %s299_s22 }
  0x1a   : > { %336 = sbr.rel (%p1214_p10) target bundleno = 375 (0x177), region = 52 }
  0x1b   : > { %872 = dma.hbm_to_vmem [thread:$0]  (!%p870_p12), %s281_s24, 512, %s283_s26, [#allocation3], %s1110_s14, %s1110_s14, %s1111_s16  }
  0x1c   : > { %875 = dma.hbm_to_vmem [thread:$0]  (!%p870_p12), %s298_s29, 512, %s300_s22, [#allocation6], %s1110_s14, %s1110_s14, %s1111_s16  }
  0x1f   : > { %1078 = dma.done.wait (%p883_p9), [#allocation3], 512  }
  0x20   : > { %1080 = vsyncadd (%p883_p9), [#allocation3], 4294966784 }
  0x21   : > { %1082 = dma.done.wait (%p883_p9), [#allocation6], 512  }
  0x22   : > { %1084 = vsyncadd (%p883_p9), [#allocation6], 4294966784  ;;  %s815_s23 = sshll.u32 %s1186_s13, 2  ;;  %s1380_s2 = sld [smem:[#allocation16_spill]]  ;;  %vm414_vm0 = vcmask 261120   ;;  %v539_v8 = vld [vmem:[#allocation2 + $0x18] sm:$0xff] }
  0x23   : > { %p389_p13 = scmp.lt.s32.totalorder %s815_s23, 7  ;;  %s1381_s0 = sld [smem:[#allocation14_spill]]  ;;  %849 = vmatpush.msra.mxu1 %v539_v8  ;;  %v538_v9 = vld [vmem:[#allocation2 + $0x10] sm:$0xff]  ;;  %v537_v11 = vld [vmem:[#allocation2 + $0x8] sm:$0xff]  ;;  %v536_v13 = vld [vmem:[#allocation2] sm:$0xff] }
  0x24   : > { %s1382_s3 = sld [smem:[#allocation17_spill]]  ;;  %v600_v14 = vld [vmem:[#allocation5 + $0x18] sm:$0xff]  ;;  %v599_v16 = vld [vmem:[#allocation5 + $0x10] sm:$0xff]  ;;  %v598_v18 = vld [vmem:[#allocation5 + $0x8] sm:$0xff]  ;;  %s1283_s27 = sand.u32 1, %s1099_s10  }
  0x25   : > { %s1389_s23 = smov (!%p389_p13, %s815_s23), 7  ;;  %850 = vmatpush.msra.mxu1 %v538_v9  ;;  %853 = vmatpush.msra.mxu2 %v600_v14  ;;  %v597_v20 = vld [vmem:[#allocation5] sm:$0xff]  ;;  %s1383_s1 = sld [smem:[#allocation15_spill]] }
  0x26   : > { %s816_s21 = sshll.u32 %s1389_s23, 3  ;;  %s813_s22 = sshll.u32 %s1283_s27, 5 }
  0x27   : > { %851 = vmatpush.msra.mxu1 %v537_v11  ;;  %854 = vmatpush.msra.mxu2 %v599_v16  ;;  %s1297_s24 = scalar_lea.vmem [#allocation7], %s813_s22  ;;  %s1305_s25 = scalar_lea.vmem [#allocation8], %s813_s22 }
  0x28   : > { %v409_v0 = vld [vmem:[%s1380_s2 + $0x18] sm:$0xff]  ;;  %v408_v1 = vld [vmem:[%s1380_s2 + $0x10] sm:$0xff]  ;;  %v407_v2 = vld [vmem:[%s1380_s2 + $0x8] sm:$0xff]  ;;  %s843_s26 = sshll.u32 %s1186_s13, 5  ;;  %s673_s28 = sshll.u32 %s1305_s25, 4  ;;  %s674_s28 = int_to_ptr.vmem [resolvable:$true] %s673_s28 }
  0x29   : > { %439 = vmatpush.msra.mxu0 %v409_v0  ;;  %845 = vmatpush.msra.mxu3 %v409_v0  ;;  %s392_s17 = scalar_lea.vmem %s1381_s0, %s816_s21  ;;  %v406_v3 = vld [vmem:[%s1380_s2] sm:$0xff]  ;;  %s655_s16 = scalar_lea.hbm %s1371_s8, %s843_s26 }
  0x2a   : > { %v402_v4 = vld [vmem:[%s392_s17] sm:$0xff]  ;;  %v403_v5 = vld [vmem:[%s392_s17 + $0x8] sm:$0xff]  ;;  %v404_v6 = vld [vmem:[%s392_s17 + $0x10] sm:$0xff]  ;;  %852 = vmatpush.msra.mxu1 %v536_v13  ;;  %855 = vmatpush.msra.mxu2 %v598_v18  ;;  %s658_s22 = sshll.u32 %s655_s16, 4  ;;  %s639_s0 = scalar_lea.sflag [#allocation4], %s1283_s27  ;;  %s659_s22 = int_to_ptr.hbm [resolvable:$true] %s658_s22 }
  0x2b   : > { %440 = vmatpush.msra.mxu0 %v408_v1  ;;  %846 = vmatpush.msra.mxu3 %v408_v1  ;;  %v405_v7 = vld [vmem:[%s392_s17 + $0x18] sm:$0xff]  ;;  %v926_v10 = vld [vmem:[%s1382_s3] ss:$0 sm:$0xff]  ;;  %s1290_s14 = scalar_lea.vmem %s1383_s1, %s816_s21  ;;  %s656_s17 = sshll.u32 %s1297_s24, 4  ;;  %s657_s17 = int_to_ptr.vmem [resolvable:$true] %s656_s17 }
  0x2c   : > { %856 = vmatpush.msra.mxu2 %v597_v20  ;;  %s672_s21 = scalar_lea.hbm %s1372_s9, %s843_s26  ;;  %s1019_s1 = sshra.s32 %s659_s22, 4  ;;  %s1020_s1 = int_to_ptr.hbm [resolvable:$true] %s1019_s1 }
  0x2d   : > { %441 = vmatpush.msra.mxu0 %v407_v2  ;;  %847 = vmatpush.msra.mxu3 %v407_v2  ;;  %s675_s29 = sshll.u32 %s672_s21, 4  ;;  %s1021_s2 = scalar_lea.hbm %s1020_s1, 32  ;;  %s676_s29 = int_to_ptr.hbm [resolvable:$true] %s675_s29 }
  0x2e   : > { %p1022_p0 = scmp.ne.s32.totalorder %s1020_s1, %s1021_s2  ;;  %s1025_s23 = scalar_lea.hbm %s1371_s8, 64 }
  0x2f   : > { %442 = vmatpush.msra.mxu0 %v406_v3  ;;  %848 = vmatpush.msra.mxu3 %v406_v3  ;;  %p1026_p3 = scmp.lt.s32.totalorder %s1020_s1, %s1371_s8  ;;  %p1027_p4 = scmp.lt.s32.totalorder %s1025_s23, %s1021_s2 }
  0x30   : > { %819 = vmatmul.msk.f32.vlgmr.msra.gmra.mxu0 %vm414_vm0, %v402_v4  ;;  %820 = vmatmul.msk.f32.vlgmr.msra.gmra.mxu3 %vm414_vm0, %v403_v5  ;;  %p1023_p1 = pnand %p1022_p0, %p1203_p5 }
  0x31   : > { %568 = vmatpush.msrb.mxu0 %v539_v8  ;;  %p1028_p7 = por %p1027_p4, %p1026_p3 }
  0x32   : > { %p1024_p2 = pneg %p1023_p1 }
  0x33   : > { %569 = vmatpush.msrb.mxu0 %v538_v9 }
  0x34   : > { %p1029_p8 = pnand %p1028_p7, %p1024_p2 }
  0x35   : > { %570 = vmatpush.msrb.mxu0 %v537_v11 }
  0x37   : > { %571 = vmatpush.msrb.mxu0 %v536_v13 }
  0x38   : > { %821 = vmatmul.msk.f32.gmra.mxu3 %vm414_vm0, %v404_v6 }
  0x39   : > { %617 = vmatpush.msra.mxu0 %v600_v14 }
  0x3b   : > { %618 = vmatpush.msra.mxu0 %v599_v16 }
  0x3d   : > { %619 = vmatpush.msra.mxu0 %v598_v18 }
  0x3f   : > { %620 = vmatpush.msra.mxu0 %v597_v20 }
  0x40   : > { %822 = vmatmul.msk.f32.gmra.mxu3 %vm414_vm0, %v405_v7 }
  0xad   : > { %v444_v12 = vpop.f32.mrf.mxu0 }
  0xae   : > { %v445_v15 = vadd.f32 %v926_v10, %v444_v12 }
  0xb0   : > { %v823_v17 = vmul.f32 -1.442695, %v445_v15 }
  0xb2   : > { %929 = vpow2.f32 %v823_v17  ;;  %v927_v17 = vld [vmem:[%s1368_s5] ss:$0 sm:$0xff] }
  0xb3   : > { %v447_v19 = vpop.f32.mrf.mxu3 }
  0xb4   : > { %v448_v21 = vadd.f32 %v926_v10, %v447_v19  ;;  %v585_v19 = vld [vmem:[%s1290_s14] sm:$0xff] }
  0xb6   : > { %v824_v22 = vmul.f32 -1.442695, %v448_v21 }
  0xb8   : > { %v930_v23 = vpop.eup %929  ;;  %931 = vpow2.f32 %v824_v22  ;;  %v928_v22 = vld [vmem:[%s1370_s7] ss:$0 sm:$0xff] }
  0xb9   : > { %v468_v24 = vadd.f32 1.0, %v930_v23 }
  0xbb   : > { %933 = vrcp.f32 %v468_v24  ;;  %v450_v25 = vpop.f32.mrf.mxu3  ;;  %vm477_vm1 = vweird.f32 %v468_v24  ;;  %v483_v32 = vand.u32 2147483648, %v468_v24  ;;  %v481_v35 = vand.u32 2147483647, %v468_v24 }
  0xbc   : > { %v1266_v26 = vadd.f32 %v926_v10, %v450_v25 }
  0xbd   : > { %v484_v41 = vor.u32 1.1754944e-38, %v483_v32  ;;  %vm482_vm4 = vcmp.eq.f32.partialorder %v481_v35, 8.507059e+37  ;;  %v587_v32 = vld [vmem:[%s1290_s14 + $0x10] sm:$0xff] }
  0xbe   : > { %v932_v27 = vpop.eup %931  ;;  %v825_v28 = vmul.f32 -1.442695, %v1266_v26 }
  0xbf   : > { %v469_v29 = vadd.f32 1.0, %v932_v27 }
  0xc0   : > { %935 = vpow2.f32 %v825_v28 }
  0xc1   : > { %v934_v30 = vpop.eup %933  ;;  %937 = vrcp.f32 %v469_v29  ;;  %v498_v48 = vand.u32 2147483648, %v469_v29  ;;  %v496_v51 = vand.u32 2147483647, %v469_v29  ;;  %vm492_vm6 = vweird.f32 %v469_v29 }
  0xc2   : > { %v473_v31 = vmul.f32 %v934_v30, %v468_v24  ;;  %vm478_vm2 = vweird.f32 %v934_v30  ;;  %v586_v24 = vld [vmem:[%s1290_s14 + $0x8] sm:$0xff] }
  0xc3   : > { %v453_v33 = vpop.f32.mrf.mxu3  ;;  %vm479_vm3 = vmor %vm477_vm1, %vm478_vm2  ;;  %v499_v55 = vor.u32 1.1754944e-38, %v498_v48  ;;  %vm497_vm8 = vcmp.eq.f32.partialorder %v496_v51, 8.507059e+37 }
  0xc4   : > { %v474_v34 = vsub.f32 1.0, %v473_v31  ;;  %v1269_v36 = vadd.f32 %v926_v10, %v453_v33 }
  0xc6   : > { %v936_v37 = vpop.eup %935  ;;  %v475_v38 = vmul.f32 %v934_v30, %v474_v34  ;;  %v826_v39 = vmul.f32 -1.442695, %v1269_v36 }
  0xc7   : > { %v938_v40 = vpop.eup %937  ;;  %v470_v42 = vadd.f32 1.0, %v936_v37 }
  0xc8   : > { %v476_v43 = vadd.f32 %v934_v30, %v475_v38  ;;  %v488_v44 = vmul.f32 %v938_v40, %v469_v29  ;;  %939 = vpow2.f32 %v826_v39  ;;  %vm493_vm5 = vweird.f32 %v938_v40  ;;  %v588_v38 = vld [vmem:[%s1290_s14 + $0x18] sm:$0xff] }
  0xc9   : > { %941 = vrcp.f32 %v470_v42  ;;  %vm494_vm7 = vmor %vm492_vm6, %vm493_vm5  ;;  %v513_v62 = vand.u32 2147483648, %v470_v42  ;;  %v511_v0 = vand.u32 2147483647, %v470_v42  ;;  %vm507_vm10 = vweird.f32 %v470_v42 }
  0xca   : > { %v480_v45 = vsel %vm479_vm3, %v934_v30, %v476_v43  ;;  %v489_v46 = vsub.f32 1.0, %v488_v44 }
  0xcb   : > { %v485_v47 = vsel %vm482_vm4, %v484_v41, %v480_v45  ;;  %v514_v3 = vor.u32 1.1754944e-38, %v513_v62  ;;  %vm512_vm12 = vcmp.eq.f32.partialorder %v511_v0, 8.507059e+37 }
  0xcc   : > { %v532_v49 = vmul.f32 %v485_v47, %v445_v15  ;;  %v490_v50 = vmul.f32 %v938_v40, %v489_v46 }
  0xce   : > { %v940_v52 = vpop.eup %939  ;;  %v491_v53 = vadd.f32 %v938_v40, %v490_v50  ;;  %827 = vmatmul.msk.f32.vlgmr.msrb.gmra.mxu0 %vm414_vm0, %v532_v49 }
  0xcf   : > { %v942_v54 = vpop.eup %941  ;;  %v471_v56 = vadd.f32 1.0, %v940_v52 }
  0xd0   : > { %v495_v57 = vsel %vm494_vm7, %v938_v40, %v491_v53  ;;  %v503_v58 = vmul.f32 %v942_v54, %v470_v42  ;;  %vm508_vm9 = vweird.f32 %v942_v54 }
  0xd1   : > { %v500_v59 = vsel %vm497_vm8, %v499_v55, %v495_v57  ;;  %943 = vrcp.f32 %v471_v56  ;;  %vm509_vm11 = vmor %vm507_vm10, %vm508_vm9  ;;  %v528_v9 = vand.u32 2147483648, %v471_v56  ;;  %v526_v11 = vand.u32 2147483647, %v471_v56 }
  0xd2   : > { %v533_v60 = vmul.f32 %v500_v59, %v448_v21  ;;  %v504_v61 = vsub.f32 1.0, %v503_v58  ;;  %vm522_vm14 = vweird.f32 %v471_v56 }
  0xd3   : > { %v529_v13 = vor.u32 1.1754944e-38, %v528_v9  ;;  %vm527_vm1 = vcmp.eq.f32.partialorder %v526_v11, 8.507059e+37 }
  0xd4   : > { %v505_v63 = vmul.f32 %v942_v54, %v504_v61  ;;  %828 = vmatmul.msk.f32.vlgmr.msra.gmra.mxu1 %vm414_vm0, %v533_v60  ;;  %832 = vmatmul.msk.f32.vlgmr.msra.gmra.mxu2 %vm414_vm0, %v533_v60 }
  0xd6   : > { %v506_v1 = vadd.f32 %v942_v54, %v505_v63  ;;  %831 = vmatmul.msk.f32.vlgmr.msra.gmra.mxu0 %vm414_vm0, %v532_v49 }
  0xd7   : > { %v944_v2 = vpop.eup %943 }
  0xd8   : > { %v510_v4 = vsel %vm509_vm11, %v942_v54, %v506_v1  ;;  %v518_v5 = vmul.f32 %v944_v2, %v471_v56  ;;  %vm523_vm13 = vweird.f32 %v944_v2 }
  0xd9   : > { %v515_v6 = vsel %vm512_vm12, %v514_v3, %v510_v4  ;;  %vm524_vm15 = vmor %vm522_vm14, %vm523_vm13 }
  0xda   : > { %v534_v7 = vmul.f32 %v515_v6, %v1266_v26  ;;  %v519_v8 = vsub.f32 1.0, %v518_v5 }
  0xdc   : > { %v520_v10 = vmul.f32 %v944_v2, %v519_v8  ;;  %829 = vmatmul.msk.f32.gmra.mxu1 %vm414_vm0, %v534_v7  ;;  %833 = vmatmul.msk.f32.gmra.mxu2 %vm414_vm0, %v534_v7 }
  0xde   : > { %v521_v12 = vadd.f32 %v944_v2, %v520_v10 }
  0xe0   : > { %v525_v14 = vsel %vm524_vm15, %v944_v2, %v521_v12 }
  0xe1   : > { %v530_v15 = vsel %vm527_vm1, %v529_v13, %v525_v14 }
  0xe2   : > { %v535_v16 = vmul.f32 %v530_v15, %v1269_v36 }
  0xe4   : > { %830 = vmatmul.msk.f32.gmra.mxu1 %vm414_vm0, %v535_v16  ;;  %834 = vmatmul.msk.f32.gmra.mxu2 %vm414_vm0, %v535_v16 }
 0x14b   : > { %v573_v18 = vpop.f32.mrf.mxu0 }
 0x14c   : > { %v574_v20 = vadd.f32 %v927_v17, %v573_v18 }
 0x14e   : > { %v589_v21 = vmul.f32 %v585_v19, %v574_v20 }
 0x150   : > { %593 = vst [vmem:[%s1297_s24] sm:$0xff] %v589_v21 }
 0x151   : > { %v576_v23 = vpop.f32.mrf.mxu1 }
 0x152   : > { %v577_v25 = vadd.f32 %v927_v17, %v576_v23 }
 0x153   : > { %v622_v26 = vpop.f32.mrf.mxu0 }
 0x154   : > { %v590_v27 = vmul.f32 %v586_v24, %v577_v25  ;;  %v623_v28 = vadd.f32 %v928_v22, %v622_v26 }
 0x156   : > { %594 = vst [vmem:[%s1297_s24 + $0x8] sm:$0xff] %v590_v27 }
 0x157   : > { %634 = vst [vmem:[%s1305_s25] sm:$0xff] %v623_v28  ;;  %v625_v29 = vpop.f32.mrf.mxu2 }
 0x158   : > { %v626_v30 = vadd.f32 %v928_v22, %v625_v29 }
 0x159   : > { %v579_v31 = vpop.f32.mrf.mxu1 }
 0x15a   : > { %635 = vst [vmem:[%s1305_s25 + $0x8] sm:$0xff] %v626_v30  ;;  %v580_v33 = vadd.f32 %v927_v17, %v579_v31 }
 0x15c   : > { %v591_v34 = vmul.f32 %v587_v32, %v580_v33 }
 0x15e   : > { %595 = vst [vmem:[%s1297_s24 + $0x10] sm:$0xff] %v591_v34 }
 0x15f   : > { %v628_v35 = vpop.f32.mrf.mxu2 }
 0x160   : > { %v629_v36 = vadd.f32 %v928_v22, %v628_v35 }
 0x161   : > { %v582_v37 = vpop.f32.mrf.mxu1 }
 0x162   : > { %636 = vst [vmem:[%s1305_s25 + $0x10] sm:$0xff] %v629_v36  ;;  %v583_v39 = vadd.f32 %v927_v17, %v582_v37 }
 0x164   : > { %v592_v40 = vmul.f32 %v588_v38, %v583_v39 }
 0x166   : > { %596 = vst [vmem:[%s1297_s24 + $0x18] sm:$0xff] %v592_v40 }
 0x167   : > { %v631_v41 = vpop.f32.mrf.mxu2 }
 0x168   : > { %1032 = shalt.err (!%p1029_p8)
}
 0x169   : > { %s1113_s24 = smov 128   ;;  %s1114_s21 = smov 8   ;;  %v632_v42 = vadd.f32 %v928_v22, %v631_v41 }
 0x16a   : > { %865 = dma.vmem_to_hbm [thread:$0]  (%p1203_p5), %s657_s17, 512, %s659_s22, %s639_s0, %s1113_s24, %s1113_s24, %s1114_s21  }
 0x16b   : > { %637 = vst [vmem:[%s1305_s25 + $0x18] sm:$0xff] %v632_v42  ;;  %s644_s14 = scalar_lea.sflag [#allocation9], %s1283_s27  ;;  %s1047_s16 = sshra.s32 %s676_s29, 4  ;;  %s1048_s16 = int_to_ptr.hbm [resolvable:$true] %s1047_s16 }
 0x16c   : > { %s1049_s1 = scalar_lea.hbm %s1048_s16, 32  ;;  %s1053_s26 = scalar_lea.hbm %s1372_s9, 64 }
 0x16d   : > { %p1050_p9 = scmp.ne.s32.totalorder %s1048_s16, %s1049_s1  ;;  %p1054_p12 = scmp.lt.s32.totalorder %s1048_s16, %s1372_s9 }
 0x16e   : > { %p1055_p13 = scmp.lt.s32.totalorder %s1053_s26, %s1049_s1 }
 0x16f   : > { %p1051_p10 = pnand %p1050_p9, %p1203_p5 }
 0x170   : > { %p1056_p0 = por %p1055_p13, %p1054_p12 }
 0x171   : > { %p1052_p11 = pneg %p1051_p10 }
 0x173   : > { %p1057_p1 = pnand %p1056_p0, %p1052_p11 }
 0x175   : > { %1060 = shalt.err (!%p1057_p1)
}
 0x176   : > { %866 = dma.vmem_to_hbm [thread:$0]  (%p1203_p5), %s674_s28, 512, %s676_s29, %s644_s14, %s1113_s24, %s1113_s24, %s1114_s21  }
 0x177 PF: > { %p887_p2 = scmp.ge.s32.totalorder %s1107_s12, 2  ;;  %s690_s0 = sand.u32 1, %s1095_s30  }
 0x178   : > { %s691_s27 = scalar_lea.sflag [#allocation4], %s690_s0 }
 0x179   : > { %p877_p3 = pnand %p887_p2, %p1207_p6 }
 0x17b   : > { %p878_p4 = pneg %p877_p3 }
 0x17d   : > { %1086 = dma.done.wait (%p878_p4), %s691_s27, 512  }
 0x17e   : > { %1088 = vsyncadd (%p878_p4), %s691_s27, 4294966784  ;;  %s701_s3 = scalar_lea.sflag [#allocation9], %s690_s0 }
 0x17f   : > { %1090 = dma.done.wait (%p878_p4), %s701_s3, 512  }
 0x180   : > { %1092 = vsyncadd (%p878_p4), %s701_s3, 4294966784  ;;  %p25_p5 = scmp.ge.s32.totalorder %s1190_s15, 4   ;;  %s1384_s30 = smov %s1099_s10 }
 0x181   : > { %s1385_s10 = smov %s1103_s11  ;;  %s1386_s11 = smov %s1201_s18 }
 0x182   : > { %s1387_s12 = smov %s1190_s15  ;;  %27 = sbr.rel (!%p25_p5) target bundleno = 12 (0xc), region = 116 }
 0x187   :  { %707 = vsyncpa [#allocation3], 1 }
 0x188   :  { %709 = vsyncpa [#allocation3 + $0x1], 1 }
 0x189   :  { %710 = vsyncpa [#allocation6], 1 }
 0x18a   :  { %711 = vsyncpa [#allocation4], 1 }
 0x18b   :  { %713 = vsyncpa [#allocation4 + $0x1], 1 }
 0x18c   :  { %714 = vsyncpa [#allocation9], 1 }
 0x18d   :  { %716 = vsyncpa [#allocation9 + $0x1], 1 }

</bundles_post_ra>
